<compile_context>
chip_gen: v5e
topology: v5e:2x2
jax: 0.10.0
libtpu: 0.0.40
codegen_flags: <defaults>
</compile_context>

<pallas_src>
import math

import jax
import jax.numpy as jnp
from jax.experimental import pallas as pl
from jax.experimental.pallas import tpu as pltpu

Z_DIM = 64
IMG_DIM = 28 * 28 * 1  # 784
HIDDEN = (256, 128, 64)
NEG_SLOPE = 0.1
MAX_TILE_B = 512  # ~85% of HBM roofline tile size on v5e/v6e, fits VMEM everywhere


def _round_up(x, m):
    return ((x + m - 1) // m) * m


def _choose_tile_b(batch):
    """Batch tile: multiple of 8, <= MAX_TILE_B.

    Tiny batches get a single exact-size tile (no redundant rows computed or
    written).  Larger batches are split into >= 2 grid steps so the "parallel"
    batch axis can shard across both TensorCores on v7x; tiles are capped at
    512 for the HBM-roofline sweet spot on v5e/v6e.
    """
    b = _round_up(batch, 8)
    if b <= 128:
        return b
    return min(MAX_TILE_B, _round_up((b + 1) // 2, 8))


def _leaky_relu(h, neg_slope=NEG_SLOPE):
    return jnp.where(h > 0, h, neg_slope * h)


def generator_kernel(x_ref,
                     w1_ref, b1_ref,
                     w2_ref, b2_ref,
                     w3_ref, b3_ref,
                     w4_ref, b4_ref,
                     o_ref):
    """Fused MLP forward for one (tile_b, z_dim) batch tile.

    x and weights are bf16 (MXU native); all dots accumulate in f32 on the
    MXU; bias add / LeakyReLU / Tanh run in f32; hidden activations are cast
    to bf16 once per layer to halve live bytes between layers.
    """
    h = x_ref[...]  # bf16 (tile_b, z_dim)

    h = _leaky_relu(
        jnp.dot(h, w1_ref[...], preferred_element_type=jnp.float32) + b1_ref[...]
    ).astype(jnp.bfloat16)

    h = _leaky_relu(
        jnp.dot(h, w2_ref[...], preferred_element_type=jnp.float32) + b2_ref[...]
    ).astype(jnp.bfloat16)

    h = _leaky_relu(
        jnp.dot(h, w3_ref[...], preferred_element_type=jnp.float32) + b3_ref[...]
    ).astype(jnp.bfloat16)

    h = jnp.dot(h, w4_ref[...], preferred_element_type=jnp.float32) + b4_ref[...]
    o_ref[...] = jnp.tanh(h).astype(o_ref.dtype)


def init_generator_params(key, z_dim=Z_DIM, img_dim=IMG_DIM, hidden=HIDDEN):
    """Deterministic init mimicking torch.nn.Linear default (U[-1/sqrt(fan_in), +]).

    Returns f32 params; weights stored (in, out) so the kernel does x @ W.
    """
    dims = (z_dim,) + tuple(hidden) + (img_dim,)
    params = []
    for i in range(len(dims) - 1):
        fan_in, fan_out = dims[i], dims[i + 1]
        key, kw, kb = jax.random.split(key, 3)
        bound = 1.0 / math.sqrt(fan_in)
        w = jax.random.uniform(kw, (fan_in, fan_out), jnp.float32, -bound, bound)
        b = jax.random.uniform(kb, (1, fan_out), jnp.float32, -bound, bound)
        params.append((w, b))
    return params


def prepare_params(params):
    """Cast weights to bf16; biases stay f32.  No output-width padding."""
    return [(w.astype(jnp.bfloat16), b.astype(jnp.float32)) for w, b in params]


@jax.jit
def generator_forward(x, prepared_params):
    """x: (B, z_dim) f32.  prepared_params: output of prepare_params()."""
    B, zd = x.shape
    (w1, b1), (w2, b2), (w3, b3), (w4, b4) = prepared_params
    out_dim = w4.shape[1]  # 784

    x = x.astype(jnp.bfloat16)  # halve the x-tile DMA; MXU input dtype

    tile_b = _choose_tile_b(B)
    grid = (pl.cdiv(B, tile_b),)

    # Weights/biases: full-array blocks with constant index maps -> resident
    # in VMEM across all batch-tile grid steps.
    resident = lambda shape: pl.BlockSpec(shape, lambda i: (0, 0))

    in_specs = [
        pl.BlockSpec((tile_b, zd), lambda i: (i, 0)),
        resident(w1.shape), resident(b1.shape),
        resident(w2.shape), resident(b2.shape),
        resident(w3.shape), resident(b3.shape),
        resident(w4.shape), resident(b4.shape),
    ]
    # Output block last dim equals the full array dim (784) -> (8,128) rule
    # satisfied; Pallas masks the ragged last batch block.
    out_specs = pl.BlockSpec((tile_b, out_dim), lambda i: (i, 0))

    # Advisory cost hint for XLA's scheduler.
    flops = 2 * B * (zd * 256 + 256 * 128 + 128 * 64 + 64 * out_dim)
    bytes_accessed = (
        B * zd * 2
        + sum(int(w.size) * 2 + int(b.size) * 4 for w, b in prepared_params)
        + B * out_dim * 4
    )
    cost = pl.CostEstimate(flops=flops,
                           transcendentals=B * out_dim,
                           bytes_accessed=bytes_accessed)

    return pl.pallas_call(
        generator_kernel,
        out_shape=jax.ShapeDtypeStruct((B, out_dim), jnp.float32),
        grid_spec=pl.GridSpec(
            grid=grid,
            in_specs=in_specs,
            out_specs=out_specs,
        ),
        compiler_params=pltpu.CompilerParams(
            dimension_semantics=("parallel",)),
        cost_estimate=cost,
    )(x, w1, b1, w2, b2, w3, b3, w4, b4)


def generator_reference_f32(x, params):
    """Pure-f32 JAX reference matching the PyTorch module semantics."""
    h = x
    for i, (w, b) in enumerate(params):
        h = h @ w + b
        h = jnp.where(h > 0, h, NEG_SLOPE * h) if i < len(params) - 1 else jnp.tanh(h)
    return h


def generator_reference_bf16(x, prepared_params):
    """Reference reproducing the kernel's exact dtype chain (bf16 x/weights/
    activations, f32 MXU accumulation, f32 bias/LeakyReLU/Tanh)."""
    h = x.astype(jnp.bfloat16)
    n = len(prepared_params)
    for i, (w, b) in enumerate(prepared_params):
        z = jnp.dot(h, w, preferred_element_type=jnp.float32) + b
        if i < n - 1:
            h = _leaky_relu(z).astype(jnp.bfloat16)
        else:
            h = jnp.tanh(z)
    return h


if __name__ == "__main__":
    key = jax.random.PRNGKey(0)
    key_x, key_p = jax.random.split(key)

    B = 8  # small example batch (exact-size tile, no padded rows)
    x = jax.random.normal(key_x, (B, Z_DIM), dtype=jnp.float32)

    params = init_generator_params(key_p)
    prepared = prepare_params(params)

    out = generator_forward(x, prepared)
    out = jax.block_until_ready(out)
    assert out.shape == (B, IMG_DIM), out.shape

    # Exact-dtype reference (bf16 weights/activations, f32 acc): tight tolerance.
    ref_bf16 = generator_reference_bf16(x, prepared)
    assert jnp.allclose(out, ref_bf16, atol=5e-3, rtol=5e-3), \
        "mismatch vs bf16 reference"

    # Pure-f32 module semantics: loose tolerance (bf16 quantization of
    # weights + inter-layer activations).
    ref_f32 = generator_reference_f32(x, params)
    assert jnp.allclose(out, ref_f32, atol=8e-2, rtol=8e-2), \
        "mismatch vs f32 reference"

    print("KERNEL_OK")
</pallas_src>

<mosaic_0001>
module attributes {stable_mosaic.version = 11 : i64} {
  func.func @generator_kernel(%arg0: i32, %arg1: memref<8x64xbf16, #tpu.memory_space<vmem>>, %arg2: memref<64x256xbf16, #tpu.memory_space<vmem>>, %arg3: memref<1x256xf32, #tpu.memory_space<vmem>>, %arg4: memref<256x128xbf16, #tpu.memory_space<vmem>>, %arg5: memref<1x128xf32, #tpu.memory_space<vmem>>, %arg6: memref<128x64xbf16, #tpu.memory_space<vmem>>, %arg7: memref<1x64xf32, #tpu.memory_space<vmem>>, %arg8: memref<64x784xbf16, #tpu.memory_space<vmem>>, %arg9: memref<1x784xf32, #tpu.memory_space<vmem>>, %arg10: memref<8x784xf32, #tpu.memory_space<vmem>>) attributes {dimension_semantics = [#tpu.dimension_semantics<parallel>], iteration_bounds = array<i64: 1>, scalar_prefetch = 0 : i64, scratch_operands = 0 : i64, tpu.core_type = #tpu.core_type<tc>, window_params = [{transform_indices = @transform_0, window_bounds = array<i64: 8, 64>}, {pipeline_mode = #tpu.pipeline_mode<synchronous>, transform_indices = @transform_1, window_bounds = array<i64: 64, 256>}, {pipeline_mode = #tpu.pipeline_mode<synchronous>, transform_indices = @transform_2, window_bounds = array<i64: 1, 256>}, {pipeline_mode = #tpu.pipeline_mode<synchronous>, transform_indices = @transform_3, window_bounds = array<i64: 256, 128>}, {pipeline_mode = #tpu.pipeline_mode<synchronous>, transform_indices = @transform_4, window_bounds = array<i64: 1, 128>}, {pipeline_mode = #tpu.pipeline_mode<synchronous>, transform_indices = @transform_5, window_bounds = array<i64: 128, 64>}, {pipeline_mode = #tpu.pipeline_mode<synchronous>, transform_indices = @transform_6, window_bounds = array<i64: 1, 64>}, {pipeline_mode = #tpu.pipeline_mode<synchronous>, transform_indices = @transform_7, window_bounds = array<i64: 64, 784>}, {pipeline_mode = #tpu.pipeline_mode<synchronous>, transform_indices = @transform_8, window_bounds = array<i64: 1, 784>}, {transform_indices = @transform_9, window_bounds = array<i64: 8, 784>}]} {
    %c0 = arith.constant 0 : index
    %c0_0 = arith.constant 0 : index
    %0 = vector.load %arg1[%c0, %c0_0] : memref<8x64xbf16, #tpu.memory_space<vmem>>, vector<8x64xbf16>
    %c0_1 = arith.constant 0 : index
    %c0_2 = arith.constant 0 : index
    %1 = vector.load %arg2[%c0_1, %c0_2] : memref<64x256xbf16, #tpu.memory_space<vmem>>, vector<64x256xbf16>
    %cst = arith.constant dense<0.000000e+00> : vector<8x256xf32>
    %2 = tpu.matmul %0, %1, %cst {dimension_numbers = #tpu.dot_dimension_numbers<[1], [0], [0], [1], [0, 0, 1, 1], [], []>} : vector<8x64xbf16>, vector<64x256xbf16>, vector<8x256xf32> -> vector<8x256xf32>
    %c0_3 = arith.constant 0 : index
    %c0_4 = arith.constant 0 : index
    %3 = vector.load %arg3[%c0_3, %c0_4] : memref<1x256xf32, #tpu.memory_space<vmem>>, vector<1x256xf32>
    %4 = vector.broadcast %3 : vector<1x256xf32> to vector<8x256xf32>
    %5 = arith.addf %2, %4 : vector<8x256xf32>
    %cst_5 = arith.constant 0.000000e+00 : f32
    %6 = vector.broadcast %cst_5 : f32 to vector<8x256xf32>
    %7 = arith.cmpf ogt, %5, %6 : vector<8x256xf32>
    %cst_6 = arith.constant 1.000000e-01 : f32
    %8 = vector.broadcast %cst_6 : f32 to vector<8x256xf32>
    %9 = arith.mulf %8, %5 : vector<8x256xf32>
    %10 = arith.select %7, %5, %9 : vector<8x256xi1>, vector<8x256xf32>
    %11 = arith.truncf %10 : vector<8x256xf32> to vector<8x256xbf16>
    %c0_7 = arith.constant 0 : index
    %c0_8 = arith.constant 0 : index
    %12 = vector.load %arg4[%c0_7, %c0_8] : memref<256x128xbf16, #tpu.memory_space<vmem>>, vector<256x128xbf16>
    %cst_9 = arith.constant dense<0.000000e+00> : vector<8x128xf32>
    %13 = tpu.matmul %11, %12, %cst_9 {dimension_numbers = #tpu.dot_dimension_numbers<[1], [0], [0], [1], [0, 0, 1, 1], [], []>} : vector<8x256xbf16>, vector<256x128xbf16>, vector<8x128xf32> -> vector<8x128xf32>
    %c0_10 = arith.constant 0 : index
    %c0_11 = arith.constant 0 : index
    %14 = vector.load %arg5[%c0_10, %c0_11] : memref<1x128xf32, #tpu.memory_space<vmem>>, vector<1x128xf32>
    %15 = vector.broadcast %14 : vector<1x128xf32> to vector<8x128xf32>
    %16 = arith.addf %13, %15 : vector<8x128xf32>
    %cst_12 = arith.constant 0.000000e+00 : f32
    %17 = vector.broadcast %cst_12 : f32 to vector<8x128xf32>
    %18 = arith.cmpf ogt, %16, %17 : vector<8x128xf32>
    %cst_13 = arith.constant 1.000000e-01 : f32
    %19 = vector.broadcast %cst_13 : f32 to vector<8x128xf32>
    %20 = arith.mulf %19, %16 : vector<8x128xf32>
    %21 = arith.select %18, %16, %20 : vector<8x128xi1>, vector<8x128xf32>
    %22 = arith.truncf %21 : vector<8x128xf32> to vector<8x128xbf16>
    %c0_14 = arith.constant 0 : index
    %c0_15 = arith.constant 0 : index
    %23 = vector.load %arg6[%c0_14, %c0_15] : memref<128x64xbf16, #tpu.memory_space<vmem>>, vector<128x64xbf16>
    %cst_16 = arith.constant dense<0.000000e+00> : vector<8x64xf32>
    %24 = tpu.matmul %22, %23, %cst_16 {dimension_numbers = #tpu.dot_dimension_numbers<[1], [0], [0], [1], [0, 0, 1, 1], [], []>} : vector<8x128xbf16>, vector<128x64xbf16>, vector<8x64xf32> -> vector<8x64xf32>
    %c0_17 = arith.constant 0 : index
    %c0_18 = arith.constant 0 : index
    %25 = vector.load %arg7[%c0_17, %c0_18] : memref<1x64xf32, #tpu.memory_space<vmem>>, vector<1x64xf32>
    %26 = vector.broadcast %25 : vector<1x64xf32> to vector<8x64xf32>
    %27 = arith.addf %24, %26 : vector<8x64xf32>
    %cst_19 = arith.constant 0.000000e+00 : f32
    %28 = vector.broadcast %cst_19 : f32 to vector<8x64xf32>
    %29 = arith.cmpf ogt, %27, %28 : vector<8x64xf32>
    %cst_20 = arith.constant 1.000000e-01 : f32
    %30 = vector.broadcast %cst_20 : f32 to vector<8x64xf32>
    %31 = arith.mulf %30, %27 : vector<8x64xf32>
    %32 = arith.select %29, %27, %31 : vector<8x64xi1>, vector<8x64xf32>
    %33 = arith.truncf %32 : vector<8x64xf32> to vector<8x64xbf16>
    %c0_21 = arith.constant 0 : index
    %c0_22 = arith.constant 0 : index
    %34 = vector.load %arg8[%c0_21, %c0_22] : memref<64x784xbf16, #tpu.memory_space<vmem>>, vector<64x784xbf16>
    %cst_23 = arith.constant dense<0.000000e+00> : vector<8x784xf32>
    %35 = tpu.matmul %33, %34, %cst_23 {dimension_numbers = #tpu.dot_dimension_numbers<[1], [0], [0], [1], [0, 0, 1, 1], [], []>} : vector<8x64xbf16>, vector<64x784xbf16>, vector<8x784xf32> -> vector<8x784xf32>
    %c0_24 = arith.constant 0 : index
    %c0_25 = arith.constant 0 : index
    %36 = vector.load %arg9[%c0_24, %c0_25] : memref<1x784xf32, #tpu.memory_space<vmem>>, vector<1x784xf32>
    %37 = vector.broadcast %36 : vector<1x784xf32> to vector<8x784xf32>
    %38 = arith.addf %35, %37 : vector<8x784xf32>
    %39 = math.tanh %38 : vector<8x784xf32>
    %c0_26 = arith.constant 0 : index
    %c0_27 = arith.constant 0 : index
    %40 = vector.load %arg10[%c0_26, %c0_27] : memref<8x784xf32, #tpu.memory_space<vmem>>, vector<8x784xf32>
    tpu.vector_store %arg10[%c0_26, %c0_27], %39 {strides = array<i32>} : memref<8x784xf32, #tpu.memory_space<vmem>>, vector<8x784xf32>,
    return
  }
  func.func @transform_0(%arg0: i32) -> (i32, i32) {
    %c0_i32 = arith.constant 0 : i32
    %c0_i32_0 = arith.constant 0 : i32
    return %arg0, %c0_i32 : i32, i32
  }
  func.func @transform_1(%arg0: i32) -> (i32, i32) {
    %c0_i32 = arith.constant 0 : i32
    %c0_i32_0 = arith.constant 0 : i32
    %c0_i32_1 = arith.constant 0 : i32
    return %c0_i32, %c0_i32_0 : i32, i32
  }
  func.func @transform_2(%arg0: i32) -> (i32, i32) {
    %c0_i32 = arith.constant 0 : i32
    %c0_i32_0 = arith.constant 0 : i32
    %c0_i32_1 = arith.constant 0 : i32
    return %c0_i32, %c0_i32_0 : i32, i32
  }
  func.func @transform_3(%arg0: i32) -> (i32, i32) {
    %c0_i32 = arith.constant 0 : i32
    %c0_i32_0 = arith.constant 0 : i32
    %c0_i32_1 = arith.constant 0 : i32
    return %c0_i32, %c0_i32_0 : i32, i32
  }
  func.func @transform_4(%arg0: i32) -> (i32, i32) {
    %c0_i32 = arith.constant 0 : i32
    %c0_i32_0 = arith.constant 0 : i32
    %c0_i32_1 = arith.constant 0 : i32
    return %c0_i32, %c0_i32_0 : i32, i32
  }
  func.func @transform_5(%arg0: i32) -> (i32, i32) {
    %c0_i32 = arith.constant 0 : i32
    %c0_i32_0 = arith.constant 0 : i32
    %c0_i32_1 = arith.constant 0 : i32
    return %c0_i32, %c0_i32_0 : i32, i32
  }
  func.func @transform_6(%arg0: i32) -> (i32, i32) {
    %c0_i32 = arith.constant 0 : i32
    %c0_i32_0 = arith.constant 0 : i32
    %c0_i32_1 = arith.constant 0 : i32
    return %c0_i32, %c0_i32_0 : i32, i32
  }
  func.func @transform_7(%arg0: i32) -> (i32, i32) {
    %c0_i32 = arith.constant 0 : i32
    %c0_i32_0 = arith.constant 0 : i32
    %c0_i32_1 = arith.constant 0 : i32
    return %c0_i32, %c0_i32_0 : i32, i32
  }
  func.func @transform_8(%arg0: i32) -> (i32, i32) {
    %c0_i32 = arith.constant 0 : i32
    %c0_i32_0 = arith.constant 0 : i32
    %c0_i32_1 = arith.constant 0 : i32
    return %c0_i32, %c0_i32_0 : i32, i32
  }
  func.func @transform_9(%arg0: i32) -> (i32, i32) {
    %c0_i32 = arith.constant 0 : i32
    %c0_i32_0 = arith.constant 0 : i32
    return %arg0, %c0_i32 : i32, i32
  }
}

</mosaic_0001>

<bundles_post_ra>
// kernel: generator_forward.1
= control target key start
LH: loop header
LB: loop body
LE: loop exit
PB: predicated region body
PF: predicated region fallthrough
CT: control target
= control target key end

     0   :  { %14 = vsyncpa [#allocation3], 0  ;;  %s1297_s0 = inlined_call_operand.vmem [shape: bf16[8,64], index: 0, kind: input, shape index: {}]   ;;  %s1298_s1 = inlined_call_operand.vmem [shape: bf16[64,256], index: 1, kind: input, shape index: {}]   ;;  %s1299_s2 = inlined_call_operand.vmem [shape: f32[1,256], index: 2, kind: input, shape index: {}]   ;;  %s1300_s3 = inlined_call_operand.hbm [shape: bf16[256,128], index: 3, kind: input, shape index: {}]   ;;  %s1301_s4 = inlined_call_operand.vmem [shape: f32[1,128], index: 4, kind: input, shape index: {}]   ;;  %s1302_s5 = inlined_call_operand.vmem [shape: bf16[128,64], index: 5, kind: input, shape index: {}]   ;;  %s1303_s6 = inlined_call_operand.vmem [shape: f32[1,64], index: 6, kind: input, shape index: {}]   ;;  %s1304_s7 = inlined_call_operand.hbm [shape: bf16[64,784], index: 7, kind: input, shape index: {}]   ;;  %s1305_s8 = inlined_call_operand.vmem [shape: f32[1,784], index: 8, kind: input, shape index: {}]   ;;  %s1306_s9 = inlined_call_operand.hbm [shape: f32[8,784], index: 9, kind: output, shape index: {}]  }
   0x1   :  { %15 = vsyncpa [#allocation6], 0 }
   0x2   :  { %16 = vsyncpa [#allocation4], 0  ;;  %s27_s11 = sshll.u32 %s1300_s3, 4  ;;  %s1135_s12 = smov [#allocation2]   ;;  %s28_s11 = int_to_ptr.hbm [resolvable:$true] %s27_s11 }
   0x3   :  { %s29_s13 = sshll.u32 %s1135_s12, 4  ;;  %s46_s16 = sshll.u32 %s1304_s7, 4  ;;  %s30_s13 = int_to_ptr.vmem [resolvable:$true] %s29_s13  ;;  %s47_s16 = int_to_ptr.hbm [resolvable:$true] %s46_s16 }
   0x4   :  { %s1136_s17 = smov 64   ;;  %s1137_s18 = smov 4  }
   0x5   :  { %35 = dma.hbm_to_vmem [thread:$0]  %s28_s11, 2048, %s30_s13, [#allocation3], %s1136_s17, %s1136_s17, %s1137_s18  }
   0x6   :  { %s1138_s19 = smov [#allocation5]   ;;  %s1139_s21 = smov 448  }
   0x7   :  { %s48_s20 = sshll.u32 %s1138_s19, 4  ;;  %s1140_s22 = smov 28   ;;  %s49_s20 = int_to_ptr.vmem [resolvable:$true] %s48_s20 }
   0x8   :  { %54 = dma.hbm_to_vmem [thread:$0]  %s47_s16, 3584, %s49_s20, [#allocation6], %s1139_s21, %s1139_s21, %s1140_s22  }
   0x9   :  { %1129 = dma.done.wait [#allocation3], 2048  }
   0xa   :  { %1130 = vsyncadd [#allocation3], 4294965248 }
   0xb   :  { %1131 = dma.done.wait [#allocation6], 3584  }
   0xc   :  { %1132 = vsyncadd [#allocation6], 4294963712  ;;  %v751_v0 = vld [vmem:[%s1298_s1 + $0x30] sm:$0xf]  ;;  %v981_v1 = vld [vmem:[%s1298_s1 + $0x34] sm:$0xf0] }
   0xd   :  { %v980_v2 = vld [vmem:[%s1298_s1 + $0x34] sm:$0xf]  ;;  %v752_v3 = vor.u32 %v981_v1, %v751_v0  ;;  %v753_v4 = vld [vmem:[%s1298_s1 + $0x38] sm:$0xf0]  ;;  %v743_v5 = vld [vmem:[%s1298_s1 + $0x20] sm:$0xf] }
   0xe   :  { %v979_v6 = vld [vmem:[%s1298_s1 + $0x24] sm:$0xf0]  ;;  %v756_v7 = vor.u32 %v980_v2, %v753_v4  ;;  %v978_v8 = vld [vmem:[%s1298_s1 + $0x24] sm:$0xf]  ;;  %v745_v9 = vld [vmem:[%s1298_s1 + $0x28] sm:$0xf0] }
   0xf   :  { %129 = vmatpush.bf16.msra.mxu0 %v752_v3  ;;  %v744_v10 = vor.u32 %v979_v6, %v743_v5  ;;  %v748_v11 = vor.u32 %v978_v8, %v745_v9  ;;  %v735_v12 = vld [vmem:[%s1298_s1 + $0x10] sm:$0xf]  ;;  %v977_v13 = vld [vmem:[%s1298_s1 + $0x14] sm:$0xf0]  ;;  %v976_v14 = vld [vmem:[%s1298_s1 + $0x14] sm:$0xf] }
  0x10   :  { %142 = vmatpush.bf16.msra.mxu1 %v756_v7  ;;  %v737_v15 = vld [vmem:[%s1298_s1 + $0x18] sm:$0xf0]  ;;  %v736_v18 = vor.u32 %v977_v13, %v735_v12  ;;  %v988_v19 = vld [vmem:[#allocation2 + $0x30] sm:$0xff]  ;;  %v727_v21 = vld [vmem:[%s1298_s1] sm:$0xf]  ;;  %vm121_vm0 = vcmask 523264  }
  0x11   :  { %v989_v16 = vld [vmem:[#allocation2 + $0x38] sm:$0xff]  ;;  %v740_v20 = vor.u32 %v976_v14, %v737_v15  ;;  %v975_v22 = vld [vmem:[%s1298_s1 + $0x4] sm:$0xf0]  ;;  %v996_v23 = vld [vmem:[#allocation2 + $0x70] sm:$0xff]  ;;  %vm705_vm5 = vcmask 130048   ;;  %s714_s30 = sshll.u32 %s1306_s9, 4  ;;  %s715_s30 = int_to_ptr.hbm [resolvable:$true] %s714_s30 }
  0x12   :  { %v997_v17 = vld [vmem:[#allocation2 + $0x78] sm:$0xff]  ;;  %291 = vmatpush.bf16.msra.mxu2 %v989_v16  ;;  %v974_v24 = vld [vmem:[%s1298_s1 + $0x4] sm:$0xf]  ;;  %v729_v25 = vld [vmem:[%s1298_s1 + $0x8] sm:$0xf0]  ;;  %v728_v26 = vor.u32 %v975_v22, %v727_v21 }
  0x13   :  { %130 = vmatpush.bf16.msra.mxu0 %v744_v10  ;;  %304 = vmatpush.bf16.msra.mxu3 %v997_v17  ;;  %v987_v27 = vld [vmem:[#allocation2 + $0x28] sm:$0xff]  ;;  %v732_v28 = vor.u32 %v974_v24, %v729_v25  ;;  %v66_v30 = vld [vmem:[%s1297_s0] sm:$0xf]  ;;  %v985_v33 = vld [vmem:[#allocation2 + $0x18] sm:$0xff] }
  0x14   :  { %143 = vmatpush.bf16.msra.mxu1 %v748_v11  ;;  %v995_v29 = vld [vmem:[#allocation2 + $0x68] sm:$0xff]  ;;  %v986_v31 = vld [vmem:[#allocation2 + $0x20] sm:$0xff]  ;;  %v993_v34 = vld [vmem:[#allocation2 + $0x58] sm:$0xff] }
  0x15   :  { %v994_v32 = vld [vmem:[#allocation2 + $0x60] sm:$0xff]  ;;  %v984_v35 = vld [vmem:[#allocation2 + $0x10] sm:$0xff]  ;;  %v983_v37 = vld [vmem:[#allocation2 + $0x8] sm:$0xff] }
  0x16   :  { %292 = vmatpush.bf16.msra.mxu2 %v988_v19  ;;  %v992_v36 = vld [vmem:[#allocation2 + $0x50] sm:$0xff]  ;;  %v991_v38 = vld [vmem:[#allocation2 + $0x48] sm:$0xff]  ;;  %v982_v39 = vld [vmem:[#allocation2] sm:$0xff] }
  0x17   :  { %131 = vmatpush.bf16.msra.mxu0 %v736_v18  ;;  %305 = vmatpush.bf16.msra.mxu3 %v996_v23  ;;  %v990_v40 = vld [vmem:[#allocation2 + $0x40] sm:$0xff]  ;;  %v1005_v41 = vld [vmem:[%s1302_s5 + $0x38] sm:$0xff]  ;;  %v1004_v42 = vld [vmem:[%s1302_s5 + $0x30] sm:$0xff] }
  0x18   :  { %144 = vmatpush.bf16.msra.mxu1 %v740_v20  ;;  %v1003_v43 = vld [vmem:[%s1302_s5 + $0x28] sm:$0xff]  ;;  %v1002_v44 = vld [vmem:[%s1302_s5 + $0x20] sm:$0xff]  ;;  %v1001_v45 = vld [vmem:[%s1302_s5 + $0x18] sm:$0xff] }
  0x19   :  { %v75_v46 = vld [vmem:[%s1299_s2] sm:$0x3]  ;;  %v1000_v47 = vld [vmem:[%s1302_s5 + $0x10] sm:$0xff]  ;;  %v999_v62 = vld [vmem:[%s1302_s5 + $0x8] sm:$0xff] }
  0x1a   :  { %293 = vmatpush.bf16.msra.mxu2 %v987_v27  ;;  %v77_v48 = vperm.slane %v75_v46, 0  ;;  %v78_v49 = vperm.slane %v75_v46, 1  ;;  %v998_v63 = vld [vmem:[%s1302_s5] sm:$0xff]  ;;  %v941_v0 = vld [vmem:[#allocation5 + $0xa8] sm:$0xf] }
  0x1b   :  { %132 = vmatpush.bf16.msra.mxu0 %v728_v26  ;;  %306 = vmatpush.bf16.msra.mxu3 %v995_v29  ;;  %v1030_v1 = vld [vmem:[#allocation5 + $0xc0] sm:$0xf0]  ;;  %v949_v2 = vld [vmem:[#allocation5 + $0xb0] sm:$0xf]  ;;  %v1031_v4 = vld [vmem:[#allocation5 + $0xc8] sm:$0xf0] }
  0x1c   :  { %145 = vmatpush.bf16.msra.mxu1 %v732_v28  ;;  %v942_v3 = vor.u32 %v1030_v1, %v941_v0  ;;  %v1028_v5 = vld [vmem:[#allocation5 + $0xb4] sm:$0xf]  ;;  %v951_v6 = vld [vmem:[#allocation5 + $0xcc] sm:$0xf0]  ;;  %v950_v7 = vor.u32 %v1031_v4, %v949_v2  ;;  %v957_v9 = vld [vmem:[#allocation5 + $0xb8] sm:$0xf] }
  0x1d   :  { %v954_v8 = vor.u32 %v1028_v5, %v951_v6  ;;  %v1032_v10 = vld [vmem:[#allocation5 + $0xd0] sm:$0xf0]  ;;  %v913_v11 = vld [vmem:[#allocation5 + $0x70] sm:$0xf]  ;;  %v1023_v13 = vld [vmem:[#allocation5 + $0x88] sm:$0xf0] }
  0x1e   :  { %757 = vmatmul.msk.bf16.vlgmr.msra.gmra.mxu0 %vm121_vm0, %v66_v30  ;;  %294 = vmatpush.bf16.msra.mxu2 %v986_v31  ;;  %v958_v12 = vor.u32 %v1032_v10, %v957_v9  ;;  %v921_v14 = vld [vmem:[#allocation5 + $0x78] sm:$0xf]  ;;  %v1024_v15 = vld [vmem:[#allocation5 + $0x90] sm:$0xf0]  ;;  %v914_v16 = vor.u32 %v1023_v13, %v913_v11  ;;  %v1021_v18 = vld [vmem:[#allocation5 + $0x7c] sm:$0xf] }
  0x1f   :  { %758 = vmatmul.msk.bf16.vlgmr.msra.gmra.mxu1 %vm121_vm0, %v66_v30  ;;  %307 = vmatpush.bf16.msra.mxu3 %v994_v32  ;;  %v922_v17 = vor.u32 %v1024_v15, %v921_v14  ;;  %v923_v19 = vld [vmem:[#allocation5 + $0x94] sm:$0xf0]  ;;  %v929_v20 = vld [vmem:[#allocation5 + $0x80] sm:$0xf]  ;;  %v1025_v22 = vld [vmem:[#allocation5 + $0x98] sm:$0xf0] }
  0x20   :  { %389 = vmatpush.bf16.msrb.mxu0 %v1005_v41  ;;  %605 = vmatpush.bf16.msrb.mxu1 %v942_v3  ;;  %v926_v21 = vor.u32 %v1021_v18, %v923_v19  ;;  %v930_v23 = vor.u32 %v1025_v22, %v929_v20  ;;  %v1041_v24 = vld [vmem:[%s1301_s4] ss:$0 sm:$0xff]  ;;  %v1020_v0 = vld [vmem:[#allocation5 + $0x74] sm:$0xf]  ;;  %v915_v1 = vld [vmem:[#allocation5 + $0x8c] sm:$0xf0] }
  0x21   :  { %v857_v46 = vld [vmem:[#allocation5] sm:$0xf]  ;;  %v937_v2 = vld [vmem:[#allocation5 + $0x88] sm:$0xf]  ;;  %v918_v3 = vor.u32 %v1020_v0, %v915_v1  ;;  %v1026_v4 = vld [vmem:[#allocation5 + $0xa0] sm:$0xf0] }
  0x22   :  { %295 = vmatpush.bf16.msra.mxu2 %v985_v33  ;;  %v938_v5 = vor.u32 %v1026_v4, %v937_v2  ;;  %v1013_v6 = vld [vmem:[#allocation5 + $0x3c] sm:$0xf]  ;;  %v1019_v9 = vld [vmem:[#allocation5 + $0x68] sm:$0xf0]  ;;  %v859_v13 = vld [vmem:[#allocation5 + $0x1c] sm:$0xf0] }
  0x23   :  { %308 = vmatpush.bf16.msra.mxu3 %v993_v34  ;;  %v885_v34 = vld [vmem:[#allocation5 + $0x38] sm:$0xf]  ;;  %v1012_v15 = vld [vmem:[#allocation5 + $0x30] sm:$0xf0]  ;;  %v1042_v18 = vld [vmem:[%s1303_s6] ss:$0 sm:$0xff] }
  0x24   :  { %390 = vmatpush.bf16.msrb.mxu0 %v1004_v42  ;;  %606 = vmatpush.bf16.msrb.mxu1 %v914_v16  ;;  %v881_v14 = vld [vmem:[#allocation5 + $0x18] sm:$0xf] }
  0x26   :  { %296 = vmatpush.bf16.msra.mxu2 %v984_v35  ;;  %v1016_v35 = vld [vmem:[#allocation5 + $0x50] sm:$0xf0] }
  0x27   :  { %309 = vmatpush.bf16.msra.mxu3 %v992_v36  ;;  %v893_v36 = vld [vmem:[#allocation5 + $0x40] sm:$0xf] }
  0x28   :  { %391 = vmatpush.bf16.msrb.mxu0 %v1003_v43  ;;  %v901_v43 = vld [vmem:[#allocation5 + $0x48] sm:$0xf] }
  0x2a   :  { %297 = vmatpush.bf16.msra.mxu2 %v983_v37  ;;  %v886_v37 = vor.u32 %v1016_v35, %v885_v34  ;;  %v1008_v34 = vld [vmem:[#allocation5 + $0x14] sm:$0xf]  ;;  %v875_v35 = vld [vmem:[#allocation5 + $0x2c] sm:$0xf0] }
  0x2b   :  { %310 = vmatpush.bf16.msra.mxu3 %v991_v38  ;;  %v1017_v38 = vld [vmem:[#allocation5 + $0x58] sm:$0xf0] }
  0x2c   :  { %392 = vmatpush.bf16.msrb.mxu0 %v1002_v44  ;;  %v894_v41 = vor.u32 %v1017_v38, %v893_v36  ;;  %v1018_v44 = vld [vmem:[#allocation5 + $0x60] sm:$0xf0]  ;;  %607 = vmatpush.bf16.msrb.mxu1 %v886_v37  ;;  %v878_v36 = vor.u32 %v1008_v34, %v875_v35 }
  0x2d   :  { %v438_v37 = vld [vmem:[%s1305_s8] sm:$0x7f]  ;;  %s1141_s8 = smov [#allocation7]  }
  0x2e   :  { %298 = vmatpush.bf16.msra.mxu2 %v982_v39  ;;  %v1014_v39 = vld [vmem:[#allocation5 + $0x44] sm:$0xf]  ;;  %v440_v38 = vperm.slane %v438_v37, 0  ;;  %v445_v2 = vperm.slane %v438_v37, 5  ;;  %s712_s27 = sshll.u32 %s1141_s8, 4  ;;  %s713_s27 = int_to_ptr.vmem [resolvable:$true] %s712_s27 }
  0x2f   :  { %311 = vmatpush.bf16.msra.mxu3 %v990_v40  ;;  %v895_v40 = vld [vmem:[#allocation5 + $0x5c] sm:$0xf0] }
  0x30   :  { %393 = vmatpush.bf16.msrb.mxu0 %v1001_v45  ;;  %v898_v42 = vor.u32 %v1014_v39, %v895_v40  ;;  %v902_v45 = vor.u32 %v1018_v44, %v901_v43  ;;  %v444_v39 = vperm.slane %v438_v37, 4  ;;  %v442_v44 = vperm.slane %v438_v37, 2 }
  0x32   :  { %631 = vmatpush.bf16.msrb.mxu2 %v950_v7  ;;  %v887_v7 = vld [vmem:[#allocation5 + $0x54] sm:$0xf0] }
  0x33   :  { %644 = vmatpush.bf16.msrb.mxu3 %v954_v8  ;;  %v909_v8 = vld [vmem:[#allocation5 + $0x50] sm:$0xf]  ;;  %v890_v10 = vor.u32 %v1013_v6, %v887_v7 }
  0x34   :  { %394 = vmatpush.bf16.msrb.mxu0 %v1000_v47  ;;  %v1009_v47 = vld [vmem:[#allocation5 + $0x18] sm:$0xf0]  ;;  %v910_v11 = vor.u32 %v1019_v9, %v909_v8 }
  0x36   :  { %632 = vmatpush.bf16.msrb.mxu2 %v922_v17  ;;  %v882_v17 = vor.u32 %v1012_v15, %v881_v14 }
  0x37   :  { %645 = vmatpush.bf16.msrb.mxu3 %v926_v21  ;;  %v1029_v21 = vld [vmem:[#allocation5 + $0xbc] sm:$0xf] }
  0x38   :  { %395 = vmatpush.bf16.msrb.mxu0 %v999_v62  ;;  %v1033_v62 = vld [vmem:[#allocation5 + $0xd8] sm:$0xf0] }
  0x3a   :  { %633 = vmatpush.bf16.msrb.mxu2 %v894_v41 }
  0x3b   :  { %646 = vmatpush.bf16.msrb.mxu3 %v898_v42 }
  0x3c   :  { %396 = vmatpush.bf16.msrb.mxu0 %v998_v63 }
  0x40   :  { %657 = vmatpush.bf16.msra.mxu0 %v958_v12  ;;  %v1006_v12 = vld [vmem:[#allocation5 + $0x4] sm:$0xf] }
  0x41   :  { %v862_v16 = vor.u32 %v1006_v12, %v859_v13 }
  0x44   :  { %658 = vmatpush.bf16.msra.mxu0 %v930_v23  ;;  %v959_v23 = vld [vmem:[#allocation5 + $0xd4] sm:$0xf0] }
  0x48   :  { %659 = vmatpush.bf16.msra.mxu0 %v902_v45  ;;  %v443_v45 = vperm.slane %v438_v37, 3 }
  0x9b   :  { %v134_v50 = vpop.f32.mrf.mxu0 }
  0x9c   :  { %v135_v51 = vadd.f32 %v134_v50, %v77_v48  ;;  %v147_v52 = vpop.f32.mrf.mxu1  ;;  %v865_v48 = vld [vmem:[#allocation5 + $0x8] sm:$0xf]  ;;  %v1010_v50 = vld [vmem:[#allocation5 + $0x20] sm:$0xf0] }
  0x9d   :  { %v148_v53 = vadd.f32 %v147_v52, %v78_v49  ;;  %v858_v49 = vor.u32 %v1009_v47, %v857_v46  ;;  %v867_v52 = vld [vmem:[#allocation5 + $0x24] sm:$0xf0] }
  0x9e   :  { %v153_v54 = vmul.f32 0.1, %v135_v51  ;;  %vm151_vm1 = vcmp.gt.f32.partialorder %v135_v51, 0.0 }
  0x9f   :  { %v154_v55 = vmul.f32 0.1, %v148_v53  ;;  %vm152_vm2 = vcmp.gt.f32.partialorder %v148_v53, 0.0  ;;  %608 = vmatpush.bf16.msrb.mxu1 %v858_v49 }
  0xa0   :  { %v155_v56 = vsel %vm151_vm1, %v135_v51, %v153_v54  ;;  %v1007_v51 = vld [vmem:[#allocation5 + $0xc] sm:$0xf] }
  0xa1   :  { %v157_v57 = vpack.c.bf16 %v155_v56, %v155_v56  ;;  %v156_v58 = vsel %vm152_vm2, %v148_v53, %v154_v55  ;;  %v866_v53 = vor.u32 %v1010_v50, %v865_v48  ;;  %v870_v54 = vor.u32 %v1007_v51, %v867_v52  ;;  %v873_v55 = vld [vmem:[#allocation5 + $0x10] sm:$0xf]  ;;  %v1011_v56 = vld [vmem:[#allocation5 + $0x28] sm:$0xf0] }
  0xa2   :  { %v158_v59 = vpack.c.bf16 %v156_v58, %v156_v58  ;;  %v1027_v58 = vld [vmem:[#allocation5 + $0xac] sm:$0xf] }
  0xa3   :  { %v136_v60 = vpop.f32.mrf.mxu0  ;;  %299 = vmatmul.bf16.vlgmr.msra.gmra.mxu2 %v157_v57  ;;  %v874_v57 = vor.u32 %v1011_v56, %v873_v55  ;;  %647 = vmatpush.bf16.msrb.mxu3 %v870_v54  ;;  %v441_v54 = vperm.slane %v438_v37, 1 }
  0xa4   :  { %v149_v61 = vpop.f32.mrf.mxu1  ;;  %312 = vmatmul.bf16.vlgmr.msra.gmra.mxu3 %v158_v59  ;;  %634 = vmatpush.bf16.msrb.mxu2 %v866_v53  ;;  %v943_v59 = vld [vmem:[#allocation5 + $0xc4] sm:$0xf0]  ;;  %v965_v60 = vld [vmem:[#allocation5 + $0xc0] sm:$0xf] }
  0xa5   :  { %660 = vmatpush.bf16.msra.mxu0 %v874_v57  ;;  %v946_v61 = vor.u32 %v1027_v58, %v943_v59  ;;  %v966_v63 = vor.u32 %v1033_v62, %v965_v60 }
  0xa7   :  { %618 = vmatpush.bf16.msra.mxu1 %v946_v61  ;;  %v446_v61 = vperm.slane %v438_v37, 6 }
  0xa8   :  { %683 = vmatpush.bf16.msra.mxu2 %v966_v63 }
  0xab   :  { %619 = vmatpush.bf16.msra.mxu1 %v918_v3 }
  0xac   :  { %684 = vmatpush.bf16.msra.mxu2 %v938_v5 }
  0xaf   :  { %620 = vmatpush.bf16.msra.mxu1 %v890_v10 }
  0xb0   :  { %685 = vmatpush.bf16.msra.mxu2 %v910_v11 }
  0xb3   :  { %621 = vmatpush.bf16.msra.mxu1 %v862_v16 }
  0xb4   :  { %686 = vmatpush.bf16.msra.mxu2 %v882_v17 }
 0x126   :  { %v300_v25 = vpop.f32.mrf.mxu2 }
 0x127   :  { %v301_v26 = vadd.f32 %v1041_v24, %v300_v25  ;;  %v313_v27 = vpop.f32.mrf.mxu3 }
 0x129   :  { %v314_v28 = vadd.f32 %v313_v27, %v301_v26  ;;  %v962_v26 = vor.u32 %v1029_v21, %v959_v23  ;;  %v1022_v27 = vld [vmem:[#allocation5 + $0x84] sm:$0xf] }
 0x12b   :  { %vm317_vm3 = vcmp.gt.f32.partialorder %v314_v28, 0.0  ;;  %v318_v29 = vmul.f32 0.1, %v314_v28 }
 0x12d   :  { %v319_v30 = vsel %vm317_vm3, %v314_v28, %v318_v29  ;;  %v931_v28 = vld [vmem:[#allocation5 + $0x9c] sm:$0xf0] }
 0x12e   :  { %v302_v31 = vpop.f32.mrf.mxu2  ;;  %v320_v32 = vpack.c.bf16 %v319_v30, %v319_v30  ;;  %v934_v30 = vor.u32 %v1022_v27, %v931_v28 }
 0x12f   :  { %v315_v33 = vpop.f32.mrf.mxu3  ;;  %v1015_v31 = vld [vmem:[#allocation5 + $0x4c] sm:$0xf] }
 0x130   :  { %397 = vmatmul.bf16.vlgmr.msrb.gmra.mxu0 %v320_v32  ;;  %v903_v32 = vld [vmem:[#allocation5 + $0x64] sm:$0xf0] }
 0x131   :  { %v906_v33 = vor.u32 %v1015_v31, %v903_v32 }
 0x1ad   :  { %v398_v19 = vpop.f32.mrf.mxu0 }
 0x1ae   :  { %v399_v20 = vadd.f32 %v1042_v18, %v398_v19 }
 0x1b0   :  { %vm402_vm4 = vcmp.gt.f32.partialorder %v399_v20, 0.0  ;;  %v403_v22 = vmul.f32 0.1, %v399_v20 }
 0x1b2   :  { %v404_v24 = vsel %vm402_vm4, %v399_v20, %v403_v22 }
 0x1b3   :  { %v405_v25 = vpack.c.bf16 %v404_v24, %v404_v24 }
 0x1b5   :  { %v400_v29 = vpop.f32.mrf.mxu0  ;;  %967 = vmatmul.msk.bf16.vlgmr.msrb.gmra.mxu1 %vm121_vm0, %v405_v25  ;;  %969 = vmatmul.msk.bf16.vlgmr.msrb.gmra.mxu2 %vm121_vm0, %v405_v25 }
 0x1b6   :  { %970 = vmatmul.msk.bf16.vlgmr.msrb.gmra.mxu3 %vm121_vm0, %v405_v25  ;;  %971 = vmatmul.msk.bf16.vlgmr.msra.gmra.mxu0 %vm121_vm0, %v405_v25 }
 0x1b7   :  { %670 = vmatpush.bf16.msrb.mxu1 %v962_v26 }
 0x1bb   :  { %671 = vmatpush.bf16.msrb.mxu1 %v934_v30 }
 0x1bf   :  { %672 = vmatpush.bf16.msrb.mxu1 %v906_v33 }
 0x1c3   :  { %673 = vmatpush.bf16.msrb.mxu1 %v878_v36 }
 0x1c5   :  { %968 = vmatmul.msk.bf16.vlgmr.msra.gmra.mxu1 %vm121_vm0, %v405_v25  ;;  %973 = vmatmul.msk.bf16.vlgmr.msra.gmra.mxu2 %vm121_vm0, %v405_v25 }
 0x1d5   :  { %972 = vmatmul.msk.bf16.vlgmr.msrb.gmra.mxu1 %vm121_vm0, %v405_v25 }
 0x232   :  { %v610_v40 = vpop.f32.mrf.mxu1 }
 0x233   :  { %v611_v41 = vadd.f32 %v610_v40, %v440_v38  ;;  %v662_v42 = vpop.f32.mrf.mxu0 }
 0x234   :  { %v663_v43 = vadd.f32 %v662_v42, %v444_v39 }
 0x235   :  { %1043 = vtanh.f32 %v611_v41 }
 0x236   :  { %1045 = vtanh.f32 %v663_v43 }
 0x238   :  { %v636_v46 = vpop.f32.mrf.mxu2 }
 0x239   :  { %v637_v47 = vadd.f32 %v636_v46, %v442_v44  ;;  %v649_v48 = vpop.f32.mrf.mxu3 }
 0x23a   :  { %v650_v49 = vadd.f32 %v649_v48, %v443_v45  ;;  %v612_v50 = vpop.f32.mrf.mxu1 }
 0x23b   :  { %v1044_v51 = vpop.eup %1043  ;;  %1047 = vtanh.f32 %v637_v47  ;;  %v664_v52 = vpop.f32.mrf.mxu0 }
 0x23c   :  { %v1046_v53 = vpop.eup %1045  ;;  %699 = vst [vmem:[#allocation7] sm:$0xff] %v1044_v51  ;;  %1049 = vtanh.f32 %v650_v49 }
 0x23d   :  { %703 = vst [vmem:[#allocation7 + $0x20] sm:$0xff] %v1046_v53 }
 0x240   :  { %v638_v55 = vpop.f32.mrf.mxu2 }
 0x241   :  { %v1048_v56 = vpop.eup %1047  ;;  %v651_v57 = vpop.f32.mrf.mxu3 }
 0x242   :  { %v1050_v58 = vpop.eup %1049  ;;  %701 = vst [vmem:[#allocation7 + $0x10] sm:$0xff] %v1048_v56  ;;  %v623_v59 = vpop.f32.mrf.mxu1 }
 0x243   :  { %702 = vst [vmem:[#allocation7 + $0x18] sm:$0xff] %v1050_v58  ;;  %v624_v60 = vadd.f32 %v623_v59, %v441_v54 }
 0x245   :  { %1051 = vtanh.f32 %v624_v60 }
 0x248   :  { %v688_v62 = vpop.f32.mrf.mxu2 }
 0x249   :  { %v689_v63 = vadd.f32 %v688_v62, %v446_v61 }
 0x24a   :  { %v625_v0 = vpop.f32.mrf.mxu1 }
 0x24b   :  { %v1052_v1 = vpop.eup %1051  ;;  %1053 = vtanh.f32 %v689_v63 }
 0x24c   :  { %700 = vst [vmem:[#allocation7 + $0x8] sm:$0xff] %v1052_v1 }
 0x250   :  { %v690_v3 = vpop.f32.mrf.mxu2 }
 0x251   :  { %v1054_v4 = vpop.eup %1053 }
 0x252   :  { %706 = vst.msk [vmem:[#allocation7 + $0x30] sm:$0xff] %vm705_vm5, %v1054_v4  ;;  %v675_v5 = vpop.f32.mrf.mxu1 }
 0x253   :  { %v676_v6 = vadd.f32 %v675_v5, %v445_v2 }
 0x255   :  { %1055 = vtanh.f32 %v676_v6 }
 0x25a   :  { %v677_v7 = vpop.f32.mrf.mxu1 }
 0x25b   :  { %v1056_v8 = vpop.eup %1055 }
 0x25c   :  { %704 = vst [vmem:[#allocation7 + $0x28] sm:$0xff] %v1056_v8 }
 0x25d   :  { %717 = dma.vmem_to_hbm [thread:$0]  %s713_s27, 896, %s715_s30, [#allocation4]  }
 0x25e   :  { %1133 = dma.done.wait [#allocation4], 896  }
 0x25f   :  { %1134 = vsyncadd [#allocation4], 4294966400 }
 0x260   :  { %722 = vsyncpa [#allocation3], 1 }
 0x261   :  { %723 = vsyncpa [#allocation6], 1 }
 0x262   :  { %724 = vsyncpa [#allocation4], 1 }

</bundles_post_ra>
